<compile_context>
chip_gen: v7x
topology: tpu7x:2x2x1
jax: 0.10.0
libtpu: 0.0.40
codegen_flags: <defaults>
</compile_context>

<pallas_src>
import math

import jax
import jax.numpy as jnp
from jax import lax
from jax.experimental import pallas as pl
from jax.experimental.pallas import tpu as pltpu


def _round_up(x, m):
    return (x + m - 1) // m * m


def _cdiv(a, b):
    return -(-a // b)


# ---------------------------------------------------------------------------
# Kernels
# ---------------------------------------------------------------------------

def _linear_kernel_f32_out(x_ref, w_ref, b_ref, o_ref):
    """float32 output: accumulate directly into the resident output block
    (its block index is constant across k) — no scratch, no epilogue copy."""
    k = pl.program_id(2)
    # x: (tm, tk), w: (tn, tk)  -> contract on dim 1 of both -> (tm, tn).
    p = lax.dot_general(
        x_ref[...], w_ref[...],
        dimension_numbers=(((1,), (1,)), ((), ())),
        preferred_element_type=jnp.float32,
    )

    @pl.when(k == 0)
    def _():
        o_ref[...] = p + b_ref[...].astype(jnp.float32)

    @pl.when(k > 0)
    def _():
        o_ref[...] += p


def _linear_kernel_acc(x_ref, w_ref, b_ref, o_ref, acc_ref):
    """Narrow output dtype (e.g. bf16): accumulate in a float32 VMEM scratch,
    add bias + cast once in the k == last epilogue."""
    k = pl.program_id(2)

    @pl.when(k == 0)
    def _():
        acc_ref[...] = jnp.zeros_like(acc_ref)

    acc_ref[...] += lax.dot_general(
        x_ref[...], w_ref[...],
        dimension_numbers=(((1,), (1,)), ((), ())),
        preferred_element_type=jnp.float32,
    )

    @pl.when(k == pl.num_programs(2) - 1)
    def _():
        o_ref[...] = (acc_ref[...] + b_ref[...].astype(jnp.float32)).astype(o_ref.dtype)


# ---------------------------------------------------------------------------
# Tile selection / wrapper
# ---------------------------------------------------------------------------

def _vmem_limit_bytes():
    # ~3/4 of physical per-core VMEM: ≈48 MiB on v7x (64 MiB), ≈96 MiB on
    # v5e/v6e (128 MiB).  Leaves headroom for Mosaic internal scratch.
    try:
        cap = pltpu.get_tpu_info().vmem_capacity_bytes
    except Exception:  # conservative fallback valid on every generation
        cap = 64 * 1024 * 1024
    return int(min(cap * 3 // 4, 100 * 1024 * 1024))


def _footprint_bytes(tm, tn, tk, in_isz, out_isz, use_acc):
    b = 2 * (tm * tk + tn * tk) * in_isz      # double-buffered x / weight tiles
    b += 2 * tm * tn * out_isz                # double-buffered output block
    b += 2 * tn * 4                           # bias block (tiny)
    if use_acc:
        b += tm * tn * 4                      # f32 accumulator scratch
    return b


def _select_tiles(M, N, K, in_isz, out_isz, use_acc, vmem_limit):
    sub = 16 if in_isz == 2 else 8            # bf16 packs 2 rows / sublane
    budget = int(vmem_limit * 0.8)

    # Asymmetric preference: HBM traffic ≈ M*K*ceil(N/tn) + N*K*ceil(M/tm),
    # so grow the tile on the larger output side.
    if M >= 2 * N:
        tm_pref, tn_pref = 1024, 1024
    else:
        tm_pref, tn_pref = 512, 2048
    tk_pref = 1024

    tm = min(tm_pref, _round_up(M, sub))
    tn = min(tn_pref, _round_up(N, 128))

    # K tiling: single k step when K fits, else split ~evenly into
    # 128-multiples so only the last <=127 K elements need zero padding.
    Kp0 = _round_up(K, 128)
    tk = min(tk_pref, Kp0)
    nk = _cdiv(Kp0, tk)
    tk = _round_up(_cdiv(Kp0, nk), 128)

    # Shrink the largest tile dim until the double-buffered footprint fits.
    while _footprint_bytes(tm, tn, tk, in_isz, out_isz, use_acc) > budget:
        if tn >= tm and tn >= tk and tn > 128:
            tn = _round_up(tn // 2, 128)
        elif tk >= tm and tk > 128:
            tk = _round_up(tk // 2, 128)
        elif tm > sub:
            tm = _round_up(tm // 2, sub)
        else:
            break

    # Megacore (v7x: 2 TensorCores): make sure the two "parallel" grid axes
    # expose >= 2 blocks so the work can shard across both cores.
    if _cdiv(M, tm) * _cdiv(N, tn) < 2:
        if _round_up(N, 128) >= 256 and N >= M:
            tn = _round_up(_round_up(N, 128) // 2, 128)
        elif _round_up(M, sub) >= 2 * sub:
            tm = _round_up(_round_up(M, sub) // 2, sub)

    return tm, tn, tk


def attn_linear(x, weight, bias, *, compute_dtype=None, out_dtype=None):
    """y = x @ weight.T + bias   (weight: (out, in), bias: (out,)).

    Applies to the last axis of an arbitrary-rank input, matching nn.Linear.
    compute_dtype=jnp.bfloat16 enables the bf16 MXU fast path (f32 accumulation
    is kept via preferred_element_type); out_dtype defaults to x.dtype."""
    N, K = weight.shape
    assert x.shape[-1] == K, "last dim of x must equal in_channels"
    assert bias.shape == (N,)

    lead = x.shape[:-1]
    M = math.prod(lead) if lead else 1
    out_dtype = jnp.dtype(out_dtype or x.dtype)

    x2d = x.reshape(M, K)
    w = weight
    if compute_dtype is not None:
        x2d = x2d.astype(compute_dtype)
        w = w.astype(compute_dtype)

    in_isz = jnp.dtype(x2d.dtype).itemsize
    out_isz = out_dtype.itemsize
    use_acc = out_dtype != jnp.float32

    vmem_limit = _vmem_limit_bytes()
    tm, tn, tk = _select_tiles(M, N, K, in_isz, out_isz, use_acc, vmem_limit)

    # Only the reduction dim is zero-padded (exact for the accumulation).
    # M/N edge blocks rely on Pallas partial-block masking — no wrapper-side
    # HBM copy of the activation/weight and no output slice on the common path.
    Kp = _round_up(K, tk)
    if Kp != K:
        x2d = jnp.pad(x2d, ((0, 0), (0, Kp - K)))
        w = jnp.pad(w, ((0, 0), (0, Kp - K)))
    b2d = bias.reshape(1, N)

    grid = (_cdiv(M, tm), _cdiv(N, tn), Kp // tk)

    cost = pl.CostEstimate(
        flops=2 * M * K * N,
        transcendentals=0,
        bytes_accessed=(M * Kp * in_isz + N * Kp * in_isz
                        + N * jnp.dtype(bias.dtype).itemsize + M * N * out_isz),
    )

    kernel = _linear_kernel_acc if use_acc else _linear_kernel_f32_out
    scratch = [pltpu.VMEM((tm, tn), jnp.float32)] if use_acc else []

    out2d = pl.pallas_call(
        kernel,
        out_shape=jax.ShapeDtypeStruct((M, N), out_dtype),
        grid_spec=pltpu.PrefetchScalarGridSpec(
            num_scalar_prefetch=0,
            grid=grid,
            in_specs=[
                pl.BlockSpec((tm, tk), lambda i, j, k: (i, k)),   # activation tile
                pl.BlockSpec((tn, tk), lambda i, j, k: (j, k)),   # weight tile (no transpose)
                pl.BlockSpec((1, tn), lambda i, j, k: (0, j)),    # bias column block
            ],
            out_specs=pl.BlockSpec((tm, tn), lambda i, j, k: (i, j)),
            scratch_shapes=scratch,
        ),
        compiler_params=pltpu.CompilerParams(
            dimension_semantics=("parallel", "parallel", "arbitrary"),
            vmem_limit_bytes=int(vmem_limit),
        ),
        cost_estimate=cost,
    )(x2d, w, b2d)

    return out2d.reshape(*lead, N)


def init_attn_linear_params(key, in_channels, out_channels, dtype=jnp.float32):
    """weight ~ Normal(0, in_channels**-0.5); bias ~ U(-1/sqrt(in), 1/sqrt(in))
    (matches the PyTorch module: custom weight init + default nn.Linear bias)."""
    kw, kb = jax.random.split(key)
    weight = (jax.random.normal(kw, (out_channels, in_channels), dtype)
              * (in_channels ** -0.5))
    bound = in_channels ** -0.5
    bias = jax.random.uniform(kb, (out_channels,), dtype,
                              minval=-bound, maxval=bound)
    return weight, bias


if __name__ == "__main__":
    key = jax.random.PRNGKey(0)
    k_x, k_p = jax.random.split(key)

    batch, seq, in_channels, out_channels = 2, 8, 32, 32
    x = jax.random.normal(k_x, (batch, seq, in_channels), jnp.float32)
    weight, bias = init_attn_linear_params(k_p, in_channels, out_channels)

    # float32 path (exact semantics of the PyTorch module).
    y = attn_linear(x, weight, bias)
    jax.block_until_ready(y)
    y_ref = x @ weight.T + bias
    assert y.shape == (batch, seq, out_channels)
    assert jnp.allclose(y, y_ref, atol=1e-5, rtol=1e-5)

    # bf16 fast path (bf16 MXU operands, f32 accumulation, bf16 output) —
    # exercises the scratch-accumulator kernel variant.
    y_bf16 = attn_linear(x, weight, bias,
                         compute_dtype=jnp.bfloat16, out_dtype=jnp.bfloat16)
    jax.block_until_ready(y_bf16)
    xb = x.astype(jnp.bfloat16).astype(jnp.float32)
    wb = weight.astype(jnp.bfloat16).astype(jnp.float32)
    y_bf16_ref = (xb @ wb.T + bias).astype(jnp.bfloat16)
    assert jnp.allclose(y_bf16.astype(jnp.float32),
                        y_bf16_ref.astype(jnp.float32), atol=3e-2, rtol=3e-2)

    print("KERNEL_OK")
</pallas_src>

<mosaic_0001>
module attributes {stable_mosaic.version = 11 : i64} {
  func.func @_linear_kernel_f32_out(%arg0: i32, %arg1: i32, %arg2: i32, %arg3: memref<8x128xf32, #tpu.memory_space<vmem>>, %arg4: memref<128x128xf32, #tpu.memory_space<vmem>>, %arg5: memref<1x128xf32, #tpu.memory_space<vmem>>, %arg6: memref<8x128xf32, #tpu.memory_space<vmem>>) attributes {dimension_semantics = [#tpu.dimension_semantics<parallel>, #tpu.dimension_semantics<parallel>, #tpu.dimension_semantics<arbitrary>], iteration_bounds = array<i64: 2, 1, 1>, scalar_prefetch = 0 : i64, scratch_operands = 0 : i64, tpu.core_type = #tpu.core_type<tc>, window_params = [{transform_indices = @transform_0, window_bounds = array<i64: 8, 128>}, {transform_indices = @transform_1, window_bounds = array<i64: 128, 128>}, {transform_indices = @transform_2, window_bounds = array<i64: 1, 128>}, {transform_indices = @transform_3, window_bounds = array<i64: 8, 128>}]} {
    %c0 = arith.constant 0 : index
    %c0_0 = arith.constant 0 : index
    %0 = vector.load %arg3[%c0, %c0_0] : memref<8x128xf32, #tpu.memory_space<vmem>>, vector<8x128xf32>
    %c0_1 = arith.constant 0 : index
    %c0_2 = arith.constant 0 : index
    %1 = vector.load %arg4[%c0_1, %c0_2] : memref<128x128xf32, #tpu.memory_space<vmem>>, vector<128x128xf32>
    %cst = arith.constant dense<0.000000e+00> : vector<8x128xf32>
    %2 = tpu.matmul %0, %1, %cst {dimension_numbers = #tpu.dot_dimension_numbers<[1], [1], [0], [0], [0, 0, 1, 0], [], []>} : vector<8x128xf32>, vector<128x128xf32>, vector<8x128xf32> -> vector<8x128xf32>
    %c0_i32 = arith.constant 0 : i32
    %3 = arith.cmpi eq, %arg2, %c0_i32 : i32
    %4 = arith.extui %3 : i1 to i32
    %c0_i32_3 = arith.constant 0 : i32
    %5 = arith.cmpi ne, %4, %c0_i32_3 : i32
    scf.if %5 {
      %c0_6 = arith.constant 0 : index
      %c0_7 = arith.constant 0 : index
      %9 = vector.load %arg5[%c0_6, %c0_7] : memref<1x128xf32, #tpu.memory_space<vmem>>, vector<1x128xf32>
      %10 = vector.broadcast %9 : vector<1x128xf32> to vector<8x128xf32>
      %11 = arith.addf %2, %10 : vector<8x128xf32>
      %c0_8 = arith.constant 0 : index
      %c0_9 = arith.constant 0 : index
      %12 = vector.load %arg6[%c0_8, %c0_9] : memref<8x128xf32, #tpu.memory_space<vmem>>, vector<8x128xf32>
      tpu.vector_store %arg6[%c0_8, %c0_9], %11 {strides = array<i32>} : memref<8x128xf32, #tpu.memory_space<vmem>>, vector<8x128xf32>,
    } else {
    }
    %c0_i32_4 = arith.constant 0 : i32
    %6 = arith.cmpi sgt, %arg2, %c0_i32_4 : i32
    %7 = arith.extui %6 : i1 to i32
    %c0_i32_5 = arith.constant 0 : i32
    %8 = arith.cmpi ne, %7, %c0_i32_5 : i32
    scf.if %8 {
      %c0_6 = arith.constant 0 : index
      %c0_7 = arith.constant 0 : index
      %9 = vector.load %arg6[%c0_6, %c0_7] : memref<8x128xf32, #tpu.memory_space<vmem>>, vector<8x128xf32>
      %10 = arith.addf %9, %2 : vector<8x128xf32>
      %c0_8 = arith.constant 0 : index
      %c0_9 = arith.constant 0 : index
      %11 = vector.load %arg6[%c0_8, %c0_9] : memref<8x128xf32, #tpu.memory_space<vmem>>, vector<8x128xf32>
      tpu.vector_store %arg6[%c0_8, %c0_9], %10 {strides = array<i32>} : memref<8x128xf32, #tpu.memory_space<vmem>>, vector<8x128xf32>,
    } else {
    }
    return
  }
  func.func @transform_0(%arg0: i32, %arg1: i32, %arg2: i32) -> (i32, i32) {
    %c0_i32 = arith.constant 0 : i32
    return %arg0, %arg2 : i32, i32
  }
  func.func @transform_1(%arg0: i32, %arg1: i32, %arg2: i32) -> (i32, i32) {
    %c0_i32 = arith.constant 0 : i32
    return %arg1, %arg2 : i32, i32
  }
  func.func @transform_2(%arg0: i32, %arg1: i32, %arg2: i32) -> (i32, i32) {
    %c0_i32 = arith.constant 0 : i32
    %c0_i32_0 = arith.constant 0 : i32
    return %c0_i32, %arg1 : i32, i32
  }
  func.func @transform_3(%arg0: i32, %arg1: i32, %arg2: i32) -> (i32, i32) {
    %c0_i32 = arith.constant 0 : i32
    return %arg0, %arg1 : i32, i32
  }
}

</mosaic_0001>

<bundles_post_ra>
// kernel: tpu_custom_call.1
= control target key start
LH: loop header
LB: loop body
LE: loop exit
PB: predicated region body
PF: predicated region fallthrough
CT: control target
= control target key end

     0   :  { %8 = vsyncpa [#allocation3], 0  ;;  %s1029_s0 = inlined_call_operand.hbm [shape: f32[16,128], index: 0, kind: input, shape index: {}]   ;;  %s1030_s1 = inlined_call_operand.hbm [shape: f32[32,128], index: 1, kind: input, shape index: {}]   ;;  %s1031_s2 = inlined_call_operand.vmem [shape: f32[1,32], index: 2, kind: input, shape index: {}]   ;;  %s1032_s3 = inlined_call_operand.hbm [shape: f32[16,32], index: 3, kind: output, shape index: {}]  }
   0x1   :  { %10 = vsyncpa [#allocation3 + $0x1], 0 }
   0x2   :  { %11 = vsyncpa [#allocation6], 0 }
   0x3   :  { %12 = vsyncpa [#allocation4], 0 }
   0x4   :  { %14 = vsyncpa [#allocation4 + $0x1], 0  ;;  %s820_s12 = smov 0   ;;  %s822_s13 = smov 0  }
   0x5   :  { %s824_s14 = smov 0   ;;  %s826_s15 = smov 0  }
   0x6   :  { %s828_s16 = smov 0   ;;  %s830_s17 = smov 0  }
   0x7 LB: > { %s851_s18 = sadd.s32 4294967295, %s790_s17   ;;  %s489_s19 = sadd.s32 4294967294, %s790_s17   ;;  %s790_s17 = sphi %s830_s17, %s20_s17   ;;  %s786_s16 = sphi %s828_s16, %s1052_s16   ;;  %s782_s15 = sphi %s826_s15, %s1051_s15   ;;  %s778_s14 = sphi %s824_s14, %s1050_s14   ;;  %s774_s13 = sphi %s822_s13, %s1049_s13   ;;  %s770_s12 = sphi %s820_s12, %s1048_s12  }
   0x8   : > { %s39_s20 = sadd.s32 1, %s786_s16  ;;  %s48_s21 = sadd.s32 1, %s778_s14 }
   0x9   : > { %p41_p0 = scmp.ge.s32.totalorder %s39_s20, 2  ;;  %p55_p1 = scmp.ne.s32.totalorder %s778_s14, %s774_s13 }
   0xa   : > { %p56_p2 = scmp.eq.s32.totalorder %s790_s17, 0  ;;  %p61_p3 = scmp.ne.s32.totalorder %s774_s13, %s770_s12 }
   0xb   : > { %s1054_s20 = smov (%p41_p0, %s39_s20), 0  ;;  %p1033_p5 = scmp.eq.s32.totalorder %s851_s18, 0 }
   0xc   : > { %p863_p4 = por %p56_p2, %p55_p1  ;;  %s43_s23 = ssub.s32 %s786_s16, %s1054_s20 }
   0xd   : > { %p141_p6 = scmp.eq.s32.totalorder %s851_s18, 1  ;;  %p46_p7 = scmp.eq.s32.totalorder %s43_s23, 0 }
   0xe   : > { %p873_p8 = por %p1033_p5, %p61_p3  ;;  %p147_p10 = scmp.eq.s32.totalorder %s489_s19, 1 }
   0xf   : > { %p877_p9 = por %p141_p6, %p55_p1  ;;  %p490_p12 = scmp.ge.s32.totalorder %s790_s17, 1 }
  0x10   : > { %s1037_s24 = scalar_select %p873_p8, 1, 0 }
  0x11   : > { %s1038_s25 = scalar_select %p877_p9, 1, 0 }
  0x12   : > { %s882_s26 = scalar_select %p46_p7, %s778_s14, %s48_s21  }
  0x13   : > { %p884_p11 = por %p147_p10, %p61_p3  ;;  %p154_p13 = scmp.lt.s32.totalorder %s790_s17, 3 }
  0x15   : > { %s1039_s27 = scalar_select %p884_p11, 1, 0 }
  0x16   : > { %p890_p0 = pnand %p490_p12, %p154_p13 }
  0x17   : > { %p491_p1 = scmp.ne.s32.totalorder (!%p890_p0), %s851_s18, 0 }
  0x18   : > { %158 = sbr.rel (%p890_p0) target bundleno = 56 (0x38), region = 12 }
  0x1f   : > { %162 = sbr.rel (%p491_p1) target bundleno = 56 (0x38), region = 16 }
  0x26   : > { %168 = vsyncadd [#allocation6], 1536  ;;  %s792_s29 = smov [#allocation5]   ;;  %s652_s6 = scalar_lea.hbm %s1030_s1, 512 }
  0x27   : > { %s174_s30 = sshll.u32 %s792_s29, 4  ;;  %p653_p2 = scmp.ne.s32.totalorder %s1030_s1, %s652_s6  ;;  %s175_s30 = int_to_ptr.vmem [resolvable:$true] %s174_s30 }
  0x28   : > { %p656_p3 = scmp.lt.u32.totalorder %s652_s6, %s1030_s1 }
  0x2a   : > { %p658_p6 = pnand %p656_p3, %p653_p2 }
  0x2c   : > { %661 = shalt.err (!%p658_p6)
}
  0x2d   : > { %s662_s11 = scalar_lea.vmem %s175_s30, 512  ;;  %s666_s19 = scalar_lea.vmem %s175_s30, 2048 }
  0x2e   : > { %p663_p7 = scmp.ne.s32.totalorder %s175_s30, %s662_s11  ;;  %p667_p10 = scmp.lt.s32.totalorder %s175_s30, %s175_s30 }
  0x2f   : > { %p668_p12 = scmp.lt.s32.totalorder %s666_s19, %s662_s11 }
  0x31   : > { %p669_p13 = por %p668_p12, %p667_p10 }
  0x33   : > { %p670_p1 = pnand %p669_p13, %p663_p7 }
  0x35   : > { %673 = shalt.err (!%p670_p1)
}
  0x36   : > { %s793_s21 = smov 128   ;;  %s794_s23 = smov 8  }
  0x37   : > { %180 = dma.hbm_to_vmem [thread:$0]  %s1030_s1, 512, %s175_s30, [#allocation6], %s793_s21, %s793_s21, %s794_s23  }
  0x38 PF: > { %p595_p3 = scmp.lt.s32.totalorder %s790_s17, 2  ;;  %s194_s5 = sand.u32 1, %s778_s14  }
  0x39   : > { %s495_s6 = sshll.u32 %s786_s16, 7  ;;  %s494_s7 = sshll.u32 %s194_s5, 3 }
  0x3a   : > { %s916_s10 = scalar_lea.hbm %s1029_s0, %s495_s6  ;;  %s198_s30 = scalar_lea.vmem [#allocation2], %s494_s7 }
  0x3b   : > { %s206_s11 = sshll.u32 %s198_s30, 4  ;;  %p920_p6 = pnand %p595_p3, %p863_p4  ;;  %s924_s11 = int_to_ptr.vmem [resolvable:$true] %s206_s11 }
  0x3c   : > { %s195_s21 = scalar_lea.sflag [#allocation3], %s194_s5  ;;  %s674_s23 = scalar_lea.hbm %s916_s10, 128 }
  0x3d   : > { %p675_p7 = scmp.ne.s32.totalorder %s916_s10, %s674_s23  ;;  %p676_p10 = pneg %p920_p6 }
  0x3e   : > { %s679_s22 = scalar_lea.hbm %s1029_s0, 256  ;;  %p680_p4 = scmp.lt.u32.totalorder %s916_s10, %s1029_s0 }
  0x3f   : > { %p677_p12 = pnand %p676_p10, %p675_p7  ;;  %p681_p1 = scmp.lt.u32.totalorder %s679_s22, %s674_s23 }
  0x40   : > { %p683_p2 = scmp.lt.u32.totalorder %s674_s23, %s916_s10 }
  0x41   : > { %p678_p13 = pneg %p677_p12  ;;  %p682_p3 = por %p681_p1, %p680_p4 }
  0x43   : > { %p684_p5 = por %p683_p2, %p682_p3 }
  0x45   : > { %p685_p11 = pnand %p684_p5, %p678_p13 }
  0x47   : > { %688 = shalt.err (!%p685_p11)
}
  0x48   : > { %s689_s5 = scalar_lea.vmem %s924_s11, 128  ;;  %s795_s8 = smov [#allocation2]  }
  0x49   : > { %p690_p7 = scmp.ne.s32.totalorder %s924_s11, %s689_s5  ;;  %s694_s9 = sshll.u32 %s795_s8, 4  ;;  %s695_s9 = int_to_ptr.vmem [resolvable:$false] %s694_s9 }
  0x4a   : > { %s696_s30 = scalar_lea.vmem %s695_s9, 256  ;;  %p697_p8 = scmp.lt.s32.totalorder %s924_s11, %s695_s9 }
  0x4b   : > { %p692_p12 = pnand %p690_p7, %p676_p10  ;;  %p698_p4 = scmp.lt.s32.totalorder %s696_s30, %s689_s5 }
  0x4d   : > { %p693_p9 = pneg %p692_p12  ;;  %p699_p1 = por %p698_p4, %p697_p8 }
  0x4f   : > { %p700_p2 = pnand %p699_p1, %p693_p9 }
  0x51   : > { %703 = shalt.err (!%p700_p2)
}
  0x52   : > { %590 = dma.hbm_to_vmem [thread:$0]  (!%p920_p6), %s916_s10, 128, %s924_s11, %s195_s21  }
  0x53   : > { %215 = sbr.rel (%p890_p0) target bundleno = 388 (0x184), region = 32  ;;  %s954_s23 = sand.u32 (!%p890_p0), 1, %s774_s13  }
  0x54   : > { %s497_s29 = sshll.u32 (!%p890_p0), %s954_s23, 3  ;;  %s218_s4 = scalar_lea.sflag (!%p890_p0), [#allocation3], %s954_s23 }
  0x55   : > { %s960_s22 = scalar_lea.vmem (!%p890_p0), [#allocation2], %s497_s29  ;;  %p1042_p5 = scmp.ne.s32.totalorder (!%p890_p0), %s1037_s24, 0 }
  0x5a   : > { %757 = dma.done.wait (%p1042_p5), %s218_s4, 128  }
  0x5b   : > { %759 = vsyncadd (%p1042_p5), %s218_s4, 4294967168  ;;  %p1043_p8 = scmp.eq.s32.totalorder %s851_s18, 0 }
  0x5d   : > { %761 = dma.done.wait (%p1043_p8), [#allocation6], 2048   ;;  %p1044_p9 = pmov %p1043_p8 }
  0x5e   : > { %v796_v0 = vmov 0.0|0.0   ;;  %vm797_vm0 = vmmov 0   ;;  %v798_v1 = vmov 0.0   ;;  %v258_v2 = vld [vmem:[#allocation5] sm:$0xff]  ;;  %v259_v3 = vld [vmem:[#allocation5 + $0x8] sm:$0xff]  ;;  %v260_v5 = vld [vmem:[#allocation5 + $0x10] sm:$0xff] }
  0x5f   : > { %763 = vsyncadd (%p1044_p9), [#allocation6], 4294965248  ;;  %557 = vmatprep.subr.bf16.mxu0 %v796_v0  ;;  %554 = vmatprep.mubr.msk.f32.mxu0 %vm797_vm0, %v798_v1  ;;  %v558_v4 = vpack.c.bf16 %v259_v3, %v258_v2  ;;  %v261_v6 = vld [vmem:[#allocation5 + $0x18] sm:$0xff]  ;;  %v262_v8 = vld [vmem:[#allocation5 + $0x20] sm:$0xff]  ;;  %s502_s28 = sshll.u32 %s782_s15, 7  ;;  %s250_s10 = scalar_lea.vmem [#allocation7], %s497_s29 }
  0x60   : > { %v561_v7 = vpack.c.bf16 %v261_v6, %v260_v5  ;;  %v263_v9 = vld [vmem:[#allocation5 + $0x28] sm:$0xff]  ;;  %v264_v11 = vld [vmem:[#allocation5 + $0x30] sm:$0xff]  ;;  %v265_v12 = vld [vmem:[#allocation5 + $0x38] sm:$0xff]  ;;  %s379_s11 = sshll.u32 %s250_s10, 4  ;;  %s980_s6 = scalar_lea.hbm %s1032_s3, %s502_s28  ;;  %s982_s11 = int_to_ptr.vmem [resolvable:$true] %s379_s11 }
  0x61   : > { %559 = vmatpush3.bf16.xpose.msra.mxu0 %v558_v4  ;;  %v564_v10 = vpack.c.bf16 %v263_v9, %v262_v8  ;;  %v567_v13 = vpack.c.bf16 %v265_v12, %v264_v11  ;;  %v266_v14 = vld [vmem:[#allocation5 + $0x40] sm:$0xff]  ;;  %v267_v15 = vld [vmem:[#allocation5 + $0x48] sm:$0xff]  ;;  %v268_v17 = vld [vmem:[#allocation5 + $0x50] sm:$0xff]  ;;  %s365_s7 = scalar_lea.sflag [#allocation4], %s954_s23  ;;  %s704_s5 = scalar_lea.vmem %s982_s11, 128 }
  0x62   : > { %560 = vmatprep.subr.bf16.mxu0 %v796_v0  ;;  %v570_v16 = vpack.c.bf16 %v267_v15, %v266_v14  ;;  %v269_v18 = vld [vmem:[#allocation5 + $0x58] sm:$0xff]  ;;  %v270_v20 = vld [vmem:[#allocation5 + $0x60] sm:$0xff]  ;;  %v271_v21 = vld [vmem:[#allocation5 + $0x68] sm:$0xff]  ;;  %p705_p11 = scmp.ne.s32.totalorder %s982_s11, %s704_s5  ;;  %p1045_p0 = scmp.ne.s32.totalorder %s1038_s25, 0 }
  0x63   : > { %v573_v19 = vpack.c.bf16 %v269_v18, %v268_v17  ;;  %v576_v22 = vpack.c.bf16 %v271_v21, %v270_v20  ;;  %v272_v23 = vld [vmem:[#allocation5 + $0x70] sm:$0xff]  ;;  %v273_v24 = vld [vmem:[#allocation5 + $0x78] sm:$0xff]  ;;  %s799_s15 = smov [#allocation7]  }
  0x64   : > { %v579_v25 = vpack.c.bf16 %v273_v24, %v272_v23  ;;  %v257_v26 = vld [vmem:[%s960_s22] sm:$0xff]  ;;  %p706_p6 = pnand %p705_p11, %p1045_p0  ;;  %s708_s8 = sshll.u32 %s799_s15, 4  ;;  %s709_s8 = int_to_ptr.vmem [resolvable:$false] %s708_s8 }
  0x65   : > { %v500_v27 = vld [vmem:[%s1031_s2] ss:$0 sm:$0xff]  ;;  %s710_s9 = scalar_lea.vmem %s709_s8, 256  ;;  %p711_p13 = scmp.lt.s32.totalorder %s982_s11, %s709_s8 }
  0x66   : > { %p707_p10 = pneg %p706_p6  ;;  %p712_p3 = scmp.lt.s32.totalorder %s710_s9, %s704_s5 }
  0x68   : > { %p713_p7 = por %p712_p3, %p711_p13 }
  0x69   : > { %562 = vmatpush3.bf16.xpose.msra.mxu0 %v561_v7 }
  0x6a   : > { %563 = vmatprep.subr.bf16.mxu0 %v796_v0  ;;  %p714_p12 = pnand %p713_p7, %p707_p10 }
  0x71   : > { %565 = vmatpush3.bf16.xpose.msra.mxu0 %v564_v10 }
  0x72   : > { %566 = vmatprep.subr.bf16.mxu0 %v796_v0 }
  0x79   : > { %568 = vmatpush3.bf16.xpose.msra.mxu0 %v567_v13 }
  0x7a   : > { %569 = vmatprep.subr.bf16.mxu0 %v796_v0 }
  0x81   : > { %571 = vmatpush3.bf16.xpose.msra.mxu0 %v570_v16 }
  0x82   : > { %572 = vmatprep.subr.bf16.mxu0 %v796_v0 }
  0x89   : > { %574 = vmatpush3.bf16.xpose.msra.mxu0 %v573_v19 }
  0x8a   : > { %575 = vmatprep.subr.bf16.mxu0 %v796_v0 }
  0x91   : > { %577 = vmatpush3.bf16.xpose.msra.mxu0 %v576_v22 }
  0x92   : > { %578 = vmatprep.subr.bf16.mxu0 %v796_v0 }
  0x99   : > { %580 = vmatpush3.bf16.xpose.msra.mxu0 %v579_v25 }
  0xa0   : > { %555 = vmatmul.mubr.f32.vlgmr.msra.gmra.mrb[0].mxu0 %v257_v26 }
 0x173   : > { %v340_v28 = vpop.f32.mrb[0].mxu0 }
 0x174   : > { %v355_v29 = vadd.f32 %v500_v27, %v340_v28  ;;  %v556_v30 = vpop.f32.mrb[1].mxu0 }
 0x176   : > { %356 = vst [vmem:[%s250_s10] sm:$0xff] %v355_v29 }
 0x177   : > { %717 = shalt.err (!%p714_p12)
}
 0x178   : > { %s718_s30 = scalar_lea.hbm %s980_s6, 128  ;;  %s722_s4 = scalar_lea.hbm %s1032_s3, 256 }
 0x179   : > { %p719_p4 = scmp.ne.s32.totalorder %s980_s6, %s718_s30  ;;  %p723_p5 = scmp.lt.u32.totalorder %s980_s6, %s1032_s3 }
 0x17a   : > { %p724_p8 = scmp.lt.u32.totalorder %s722_s4, %s718_s30  ;;  %p726_p11 = scmp.lt.u32.totalorder %s718_s30, %s980_s6 }
 0x17b   : > { %p720_p1 = pnand %p719_p4, %p1045_p0 }
 0x17c   : > { %p725_p9 = por %p724_p8, %p723_p5 }
 0x17d   : > { %p721_p2 = pneg %p720_p1 }
 0x17e   : > { %p727_p6 = por %p726_p11, %p725_p9 }
 0x180   : > { %p728_p10 = pnand %p727_p6, %p721_p2 }
 0x182   : > { %731 = shalt.err (!%p728_p10)
}
 0x183   : > { %585 = dma.vmem_to_hbm [thread:$0]  (%p1045_p0), %s982_s11, 128, %s980_s6, %s365_s7  }
 0x184 PF: > { %s391_s24 = sand.u32 1, %s770_s12   ;;  %p1046_p13 = scmp.ne.s32.totalorder %s1039_s27, 0 }
 0x185   : > { %p1047_p3 = scmp.ge.s32.totalorder %s790_s17, 2  ;;  %s392_s28 = scalar_lea.sflag [#allocation4], %s391_s24 }
 0x187   : > { %p592_p7 = pnand %p1047_p3, %p1046_p13 }
 0x189   : > { %765 = dma.done.wait (!%p592_p7), %s392_s28, 128  }
 0x18a   : > { %767 = vsyncadd (!%p592_p7), %s392_s28, 4294967168  ;;  %s20_s17 = sadd.s32 1, %s790_s17   ;;  %s1048_s12 = smov %s774_s13 }
 0x18b   : > { %p17_p12 = scmp.ge.s32.totalorder %s20_s17, 4   ;;  %s1049_s13 = smov %s778_s14 }
 0x18c   : > { %s1050_s14 = smov %s882_s26  ;;  %s1051_s15 = smov %s786_s16 }
 0x18d   : > { %s1052_s16 = smov %s1054_s20  ;;  %19 = sbr.rel (!%p17_p12) target bundleno = 7 (0x7), region = 93 }
 0x194   :  { %397 = vsyncpa [#allocation3], 1 }
 0x195   :  { %399 = vsyncpa [#allocation3 + $0x1], 1 }
 0x196   :  { %400 = vsyncpa [#allocation6], 1 }
 0x197   :  { %401 = vsyncpa [#allocation4], 1 }
 0x198   :  { %403 = vsyncpa [#allocation4 + $0x1], 1 }

</bundles_post_ra>
